<compile_context>
chip_gen: v7x
topology: tpu7x:2x2x1
jax: 0.10.0
libtpu: 0.0.40
codegen_flags: <defaults>
</compile_context>

<pallas_src>
import jax
import jax.numpy as jnp
from jax.experimental import pallas as pl
from jax.experimental.pallas import tpu as pltpu

GEM_P = 3.0      # GeM pooling exponent (pooling.GeM default p=3)
GEM_EPS = 1e-6   # GeM clamp epsilon
LANE = 128


def _round_up(x, m):
    return ((x + m - 1) // m) * m


def _pick_tile_n(n, max_tile=1024):
    """Largest multiple-of-8 divisor of n that is <= max_tile (whole n if small)."""
    if n <= max_tile:
        return n
    t = max_tile - (max_tile % 8)
    while t >= 8:
        if n % t == 0:
            return t
        t -= 8
    return n


def minkloc_kernel(x_ref, w0_ref, b0_ref, w1_ref, b1_ref, w2_ref, b2_ref,
                   o_ref, acc_ref):
    """Grid = (batch, n_tiles).  One N-tile of one sample per step.

    x_ref  : (1, TN, Cin)  bf16 point-feature tile
    w*_ref : bf16 weights (hidden/feature dims padded to 128 lanes)
    b*_ref : f32 biases
    o_ref  : (1, 1, Fp)    f32 pooled descriptor (written on the last N-tile)
    acc_ref: (1, Fp)       f32 running sum of clamp(f, eps)^p over N
    """
    n = pl.program_id(1)

    @pl.when(n == 0)
    def _():
        acc_ref[...] = jnp.zeros_like(acc_ref)

    # ---- Backbone (1x1 sparse-conv equivalent): lin -> ReLU -> lin -> ReLU -> lin
    # Layer 0 has tiny Cin: compute as Cin broadcast-FMAs on the VPU (f32)
    # instead of a K=4 MXU pass.
    x = x_ref[0].astype(jnp.float32)            # (TN, Cin)
    w0 = w0_ref[...].astype(jnp.float32)        # (Cin, Hp)
    cin = x.shape[1]
    h = x[:, 0:1] * w0[0:1, :] + b0_ref[...]    # (TN, Hp)
    for c in range(1, cin):                     # static unroll, Cin is tiny
        h = h + x[:, c:c + 1] * w0[c:c + 1, :]
    h = jnp.maximum(h, 0.0)

    # Layers 1/2: bf16 MXU matmuls with f32 accumulation; elementwise stays f32.
    h = jnp.dot(h.astype(jnp.bfloat16), w1_ref[...],
                preferred_element_type=jnp.float32) + b1_ref[...]
    h = jnp.maximum(h, 0.0)
    f = jnp.dot(h.astype(jnp.bfloat16), w2_ref[...],
                preferred_element_type=jnp.float32) + b2_ref[...]    # (TN, Fp)

    # ---- GeM pooling: accumulate sum_i clamp(f_i, eps)^3 for this N-tile ----
    fc = jnp.maximum(f, GEM_EPS)
    fc3 = (fc * fc) * fc                        # VPU multiplies, not pow/EUP
    acc_ref[...] += jnp.sum(fc3, axis=0, keepdims=True)

    @pl.when(n == pl.num_programs(1) - 1)
    def _():
        n_total = x_ref.shape[1] * pl.num_programs(1)
        pooled = acc_ref[...] * (1.0 / n_total)          # (1, Fp)
        o_ref[0] = pooled ** (1.0 / GEM_P)               # pow only on Fp lanes


def minkloc_forward(features, params, *, tile_n=None):
    """features: (B, N, Cin) float32.  Returns (B, output_dim) float32."""
    B, N, Cin = features.shape
    w0, b0, w1, b1, w2, b2 = params
    H = w0.shape[1]
    F = w2.shape[1]
    Hp = _round_up(H, LANE)
    Fp = _round_up(F, LANE)

    # Zero-pad hidden / feature channel dims to 128-lane density.  Padded
    # columns stay exactly 0 through the ReLUs, contribute nothing to the
    # later matmuls, and are sliced off after pooling.
    w0p = jnp.pad(w0, ((0, 0), (0, Hp - H))).astype(jnp.bfloat16)
    b0p = jnp.pad(b0, ((0, 0), (0, Hp - H))).astype(jnp.float32)
    w1p = jnp.pad(w1, ((0, Hp - H), (0, Hp - H))).astype(jnp.bfloat16)
    b1p = jnp.pad(b1, ((0, 0), (0, Hp - H))).astype(jnp.float32)
    w2p = jnp.pad(w2, ((0, Hp - H), (0, Fp - F))).astype(jnp.bfloat16)
    b2p = jnp.pad(b2, ((0, 0), (0, Fp - F))).astype(jnp.float32)

    # bf16 x stream halves HBM traffic; all accumulation stays f32 in-kernel.
    xb = features.astype(jnp.bfloat16)

    if tile_n is None:
        tile_n = _pick_tile_n(N)
    assert N % tile_n == 0, (N, tile_n)
    n_tiles = N // tile_n

    grid_spec = pltpu.PrefetchScalarGridSpec(
        num_scalar_prefetch=0,
        grid=(B, n_tiles),
        in_specs=[
            pl.BlockSpec((1, tile_n, Cin), lambda b, n: (b, n, 0)),
            # TODO(synk): at realistic sizes (H=F=256), single-buffer these
            # constant-index weight blocks (pipeline_mode=pl.Buffered(1)) or
            # pre-stage them into VMEM scratch to save VMEM on v7x (64 MiB).
            pl.BlockSpec((Cin, Hp), lambda b, n: (0, 0)),
            pl.BlockSpec((1, Hp), lambda b, n: (0, 0)),
            pl.BlockSpec((Hp, Hp), lambda b, n: (0, 0)),
            pl.BlockSpec((1, Hp), lambda b, n: (0, 0)),
            pl.BlockSpec((Hp, Fp), lambda b, n: (0, 0)),
            pl.BlockSpec((1, Fp), lambda b, n: (0, 0)),
        ],
        out_specs=pl.BlockSpec((1, 1, Fp), lambda b, n: (b, 0, 0)),
        scratch_shapes=[pltpu.VMEM((1, Fp), jnp.float32)],
    )

    out = pl.pallas_call(
        minkloc_kernel,
        out_shape=jax.ShapeDtypeStruct((B, 1, Fp), jnp.float32),
        grid_spec=grid_spec,
        compiler_params=pltpu.CompilerParams(
            dimension_semantics=("parallel", "arbitrary"),
            vmem_limit_bytes=32 * 1024 * 1024,
        ),
    )(xb, w0p, b0p, w1p, b1p, w2p, b2p)

    return out.reshape(B, Fp)[:, :F]


def minkloc_reference(features, params):
    """Pure-JAX reference mirroring the kernel's bf16-input / f32-accumulate math."""
    w0, b0, w1, b1, w2, b2 = params
    xq = features.astype(jnp.bfloat16).astype(jnp.float32)
    w0q = w0.astype(jnp.bfloat16).astype(jnp.float32)
    h = jnp.maximum(jnp.einsum("bnc,ch->bnh", xq, w0q) + b0, 0.0)
    h = jnp.maximum(
        jnp.einsum("bnh,hk->bnk", h.astype(jnp.bfloat16), w1.astype(jnp.bfloat16),
                   preferred_element_type=jnp.float32) + b1, 0.0)
    f = jnp.einsum("bnk,kf->bnf", h.astype(jnp.bfloat16), w2.astype(jnp.bfloat16),
                   preferred_element_type=jnp.float32) + b2
    fc = jnp.maximum(f, GEM_EPS)
    return jnp.mean((fc * fc) * fc, axis=1) ** (1.0 / GEM_P)


if __name__ == "__main__":
    # Small config consistent with MinkLoc(model='MinkFPN_GeM', ...):
    #   feature_size == output_dim (asserted by the module for GeM pooling).
    B, N = 2, 512           # batch size, (dense) points per sample
    in_channels = 4
    planes = 32             # backbone hidden width
    feature_size = 32
    output_dim = 32
    assert feature_size == output_dim, "output_dim must be the same as feature_size"

    key = jax.random.PRNGKey(0)
    k_x, k0, k1, k2 = jax.random.split(key, 4)

    features = jax.random.normal(k_x, (B, N, in_channels), dtype=jnp.float32)

    # Deterministic parameter init (synthetic weights, no checkpoint load).
    w0 = jax.random.normal(k0, (in_channels, planes), dtype=jnp.float32) * 0.1
    b0 = jnp.zeros((1, planes), dtype=jnp.float32)
    w1 = jax.random.normal(k1, (planes, planes), dtype=jnp.float32) * 0.1
    b1 = jnp.zeros((1, planes), dtype=jnp.float32)
    w2 = jax.random.normal(k2, (planes, feature_size), dtype=jnp.float32) * 0.1
    b2 = jnp.zeros((1, feature_size), dtype=jnp.float32)
    params = (w0, b0, w1, b1, w2, b2)

    # tile_n=128 -> grid (B, 4): exercises the tiled-N accumulator path.
    out = minkloc_forward(features, params, tile_n=128)
    out = jax.block_until_ready(out)

    assert out.shape == (B, output_dim), out.shape
    ref = minkloc_reference(features, params)
    assert jnp.allclose(out, ref, atol=1e-3, rtol=1e-2), (
        float(jnp.max(jnp.abs(out - ref))))

    print("KERNEL_OK")
</pallas_src>

<mosaic_0001>
module attributes {stable_mosaic.version = 11 : i64} {
  func.func @minkloc_kernel(%arg0: i32, %arg1: i32, %arg2: memref<1x128x4xbf16, #tpu.memory_space<vmem>>, %arg3: memref<4x128xbf16, #tpu.memory_space<vmem>>, %arg4: memref<1x128xf32, #tpu.memory_space<vmem>>, %arg5: memref<128x128xbf16, #tpu.memory_space<vmem>>, %arg6: memref<1x128xf32, #tpu.memory_space<vmem>>, %arg7: memref<128x128xbf16, #tpu.memory_space<vmem>>, %arg8: memref<1x128xf32, #tpu.memory_space<vmem>>, %arg9: memref<1x1x128xf32, #tpu.memory_space<vmem>>, %arg10: memref<1x128xf32, #tpu.memory_space<vmem>>) attributes {dimension_semantics = [#tpu.dimension_semantics<parallel>, #tpu.dimension_semantics<arbitrary>], iteration_bounds = array<i64: 2, 4>, scalar_prefetch = 0 : i64, scratch_operands = 1 : i64, tpu.core_type = #tpu.core_type<tc>, window_params = [{transform_indices = @transform_0, window_bounds = array<i64: 1, 128, 4>}, {pipeline_mode = #tpu.pipeline_mode<synchronous>, transform_indices = @transform_1, window_bounds = array<i64: 4, 128>}, {pipeline_mode = #tpu.pipeline_mode<synchronous>, transform_indices = @transform_2, window_bounds = array<i64: 1, 128>}, {pipeline_mode = #tpu.pipeline_mode<synchronous>, transform_indices = @transform_3, window_bounds = array<i64: 128, 128>}, {pipeline_mode = #tpu.pipeline_mode<synchronous>, transform_indices = @transform_4, window_bounds = array<i64: 1, 128>}, {pipeline_mode = #tpu.pipeline_mode<synchronous>, transform_indices = @transform_5, window_bounds = array<i64: 128, 128>}, {pipeline_mode = #tpu.pipeline_mode<synchronous>, transform_indices = @transform_6, window_bounds = array<i64: 1, 128>}, {transform_indices = @transform_7, window_bounds = array<i64: 1, 1, 128>}]} {
    %c0_i32 = arith.constant 0 : i32
    %0 = arith.cmpi eq, %arg1, %c0_i32 : i32
    %1 = arith.extui %0 : i1 to i32
    %c0_i32_0 = arith.constant 0 : i32
    %2 = arith.cmpi ne, %1, %c0_i32_0 : i32
    scf.if %2 {
      %cst_25 = arith.constant 0.000000e+00 : f32
      %62 = vector.broadcast %cst_25 : f32 to vector<1x128xf32>
      %c0_26 = arith.constant 0 : index
      %c0_27 = arith.constant 0 : index
      %63 = vector.load %arg10[%c0_26, %c0_27] : memref<1x128xf32, #tpu.memory_space<vmem>>, vector<1x128xf32>
      tpu.vector_store %arg10[%c0_26, %c0_27], %62 {strides = array<i32>} : memref<1x128xf32, #tpu.memory_space<vmem>>, vector<1x128xf32>,
    } else {
    }
    %c0 = arith.constant 0 : index
    %c0_1 = arith.constant 0 : index
    %c0_2 = arith.constant 0 : index
    %3 = vector.load %arg2[%c0, %c0_1, %c0_2] : memref<1x128x4xbf16, #tpu.memory_space<vmem>>, vector<1x128x4xbf16>
    %4 = vector.shape_cast %3 : vector<1x128x4xbf16> to vector<128x4xbf16>
    %5 = arith.extf %4 : vector<128x4xbf16> to vector<128x4xf32>
    %c0_3 = arith.constant 0 : index
    %c0_4 = arith.constant 0 : index
    %6 = vector.load %arg3[%c0_3, %c0_4] : memref<4x128xbf16, #tpu.memory_space<vmem>>, vector<4x128xbf16>
    %7 = arith.extf %6 : vector<4x128xbf16> to vector<4x128xf32>
    %8 = vector.extract_strided_slice %5 {offsets = [0, 0], sizes = [128, 1], strides = [1, 1]} : vector<128x4xf32> to vector<128x1xf32>
    %9 = vector.extract_strided_slice %7 {offsets = [0, 0], sizes = [1, 128], strides = [1, 1]} : vector<4x128xf32> to vector<1x128xf32>
    %10 = vector.broadcast %8 : vector<128x1xf32> to vector<128x128xf32>
    %11 = vector.broadcast %9 : vector<1x128xf32> to vector<128x128xf32>
    %12 = arith.mulf %10, %11 : vector<128x128xf32>
    %c0_5 = arith.constant 0 : index
    %c0_6 = arith.constant 0 : index
    %13 = vector.load %arg4[%c0_5, %c0_6] : memref<1x128xf32, #tpu.memory_space<vmem>>, vector<1x128xf32>
    %14 = vector.broadcast %13 : vector<1x128xf32> to vector<128x128xf32>
    %15 = arith.addf %12, %14 : vector<128x128xf32>
    %16 = vector.extract_strided_slice %5 {offsets = [0, 1], sizes = [128, 1], strides = [1, 1]} : vector<128x4xf32> to vector<128x1xf32>
    %17 = vector.extract_strided_slice %7 {offsets = [1, 0], sizes = [1, 128], strides = [1, 1]} : vector<4x128xf32> to vector<1x128xf32>
    %18 = vector.broadcast %16 : vector<128x1xf32> to vector<128x128xf32>
    %19 = vector.broadcast %17 : vector<1x128xf32> to vector<128x128xf32>
    %20 = arith.mulf %18, %19 : vector<128x128xf32>
    %21 = arith.addf %15, %20 : vector<128x128xf32>
    %22 = vector.extract_strided_slice %5 {offsets = [0, 2], sizes = [128, 1], strides = [1, 1]} : vector<128x4xf32> to vector<128x1xf32>
    %23 = vector.extract_strided_slice %7 {offsets = [2, 0], sizes = [1, 128], strides = [1, 1]} : vector<4x128xf32> to vector<1x128xf32>
    %24 = vector.broadcast %22 : vector<128x1xf32> to vector<128x128xf32>
    %25 = vector.broadcast %23 : vector<1x128xf32> to vector<128x128xf32>
    %26 = arith.mulf %24, %25 : vector<128x128xf32>
    %27 = arith.addf %21, %26 : vector<128x128xf32>
    %28 = vector.extract_strided_slice %5 {offsets = [0, 3], sizes = [128, 1], strides = [1, 1]} : vector<128x4xf32> to vector<128x1xf32>
    %29 = vector.extract_strided_slice %7 {offsets = [3, 0], sizes = [1, 128], strides = [1, 1]} : vector<4x128xf32> to vector<1x128xf32>
    %30 = vector.broadcast %28 : vector<128x1xf32> to vector<128x128xf32>
    %31 = vector.broadcast %29 : vector<1x128xf32> to vector<128x128xf32>
    %32 = arith.mulf %30, %31 : vector<128x128xf32>
    %33 = arith.addf %27, %32 : vector<128x128xf32>
    %cst = arith.constant 0.000000e+00 : f32
    %34 = vector.broadcast %cst : f32 to vector<128x128xf32>
    %35 = arith.maximumf %33, %34 : vector<128x128xf32>
    %36 = arith.truncf %35 : vector<128x128xf32> to vector<128x128xbf16>
    %c0_7 = arith.constant 0 : index
    %c0_8 = arith.constant 0 : index
    %37 = vector.load %arg5[%c0_7, %c0_8] : memref<128x128xbf16, #tpu.memory_space<vmem>>, vector<128x128xbf16>
    %cst_9 = arith.constant dense<0.000000e+00> : vector<128x128xf32>
    %38 = tpu.matmul %36, %37, %cst_9 {dimension_numbers = #tpu.dot_dimension_numbers<[1], [0], [0], [1], [0, 0, 1, 1], [], []>} : vector<128x128xbf16>, vector<128x128xbf16>, vector<128x128xf32> -> vector<128x128xf32>
    %c0_10 = arith.constant 0 : index
    %c0_11 = arith.constant 0 : index
    %39 = vector.load %arg6[%c0_10, %c0_11] : memref<1x128xf32, #tpu.memory_space<vmem>>, vector<1x128xf32>
    %40 = vector.broadcast %39 : vector<1x128xf32> to vector<128x128xf32>
    %41 = arith.addf %38, %40 : vector<128x128xf32>
    %cst_12 = arith.constant 0.000000e+00 : f32
    %42 = vector.broadcast %cst_12 : f32 to vector<128x128xf32>
    %43 = arith.maximumf %41, %42 : vector<128x128xf32>
    %44 = arith.truncf %43 : vector<128x128xf32> to vector<128x128xbf16>
    %c0_13 = arith.constant 0 : index
    %c0_14 = arith.constant 0 : index
    %45 = vector.load %arg7[%c0_13, %c0_14] : memref<128x128xbf16, #tpu.memory_space<vmem>>, vector<128x128xbf16>
    %cst_15 = arith.constant dense<0.000000e+00> : vector<128x128xf32>
    %46 = tpu.matmul %44, %45, %cst_15 {dimension_numbers = #tpu.dot_dimension_numbers<[1], [0], [0], [1], [0, 0, 1, 1], [], []>} : vector<128x128xbf16>, vector<128x128xbf16>, vector<128x128xf32> -> vector<128x128xf32>
    %c0_16 = arith.constant 0 : index
    %c0_17 = arith.constant 0 : index
    %47 = vector.load %arg8[%c0_16, %c0_17] : memref<1x128xf32, #tpu.memory_space<vmem>>, vector<1x128xf32>
    %48 = vector.broadcast %47 : vector<1x128xf32> to vector<128x128xf32>
    %49 = arith.addf %46, %48 : vector<128x128xf32>
    %cst_18 = arith.constant 9.99999997E-7 : f32
    %50 = vector.broadcast %cst_18 : f32 to vector<128x128xf32>
    %51 = arith.maximumf %49, %50 : vector<128x128xf32>
    %52 = arith.mulf %51, %51 : vector<128x128xf32>
    %53 = arith.mulf %52, %51 : vector<128x128xf32>
    %c0_19 = arith.constant 0 : index
    %c0_20 = arith.constant 0 : index
    %54 = vector.load %arg10[%c0_19, %c0_20] : memref<1x128xf32, #tpu.memory_space<vmem>>, vector<1x128xf32>
    %cst_21 = arith.constant dense<0.000000e+00> : vector<128xf32>
    %55 = vector.multi_reduction <add>, %53, %cst_21 [0] : vector<128x128xf32> to vector<128xf32>
    %56 = vector.shape_cast %55 : vector<128xf32> to vector<1x128xf32>
    %57 = arith.addf %54, %56 : vector<1x128xf32>
    %c0_22 = arith.constant 0 : index
    %c0_23 = arith.constant 0 : index
    %58 = vector.load %arg10[%c0_22, %c0_23] : memref<1x128xf32, #tpu.memory_space<vmem>>, vector<1x128xf32>
    tpu.vector_store %arg10[%c0_22, %c0_23], %57 {strides = array<i32>} : memref<1x128xf32, #tpu.memory_space<vmem>>, vector<1x128xf32>,
    %c3_i32 = arith.constant 3 : i32
    %59 = arith.cmpi eq, %arg1, %c3_i32 : i32
    %60 = arith.extui %59 : i1 to i32
    %c0_i32_24 = arith.constant 0 : i32
    %61 = arith.cmpi ne, %60, %c0_i32_24 : i32
    scf.if %61 {
      %c0_25 = arith.constant 0 : index
      %c0_26 = arith.constant 0 : index
      %62 = vector.load %arg10[%c0_25, %c0_26] : memref<1x128xf32, #tpu.memory_space<vmem>>, vector<1x128xf32>
      %cst_27 = arith.constant 0.001953125 : f32
      %63 = vector.broadcast %cst_27 : f32 to vector<1x128xf32>
      %64 = arith.mulf %62, %63 : vector<1x128xf32>
      %cst_28 = arith.constant 0.333333343 : f32
      %65 = vector.broadcast %cst_28 : f32 to vector<1x128xf32>
      %66 = math.powf %64, %65 : vector<1x128xf32>
      %c0_29 = arith.constant 0 : index
      %c0_30 = arith.constant 0 : index
      %c0_31 = arith.constant 0 : index
      %67 = vector.load %arg9[%c0_29, %c0_30, %c0_31] : memref<1x1x128xf32, #tpu.memory_space<vmem>>, vector<1x1x128xf32>
      %68 = vector.shape_cast %67 : vector<1x1x128xf32> to vector<1x128xf32>
      %69 = vector.shape_cast %66 : vector<1x128xf32> to vector<1x1x128xf32>
      tpu.vector_store %arg9[%c0_29, %c0_30, %c0_31], %69 {strides = array<i32>} : memref<1x1x128xf32, #tpu.memory_space<vmem>>, vector<1x1x128xf32>,
    } else {
    }
    return
  }
  func.func @transform_0(%arg0: i32, %arg1: i32) -> (i32, i32, i32) {
    %c0_i32 = arith.constant 0 : i32
    %c0_i32_0 = arith.constant 0 : i32
    return %arg0, %arg1, %c0_i32 : i32, i32, i32
  }
  func.func @transform_1(%arg0: i32, %arg1: i32) -> (i32, i32) {
    %c0_i32 = arith.constant 0 : i32
    %c0_i32_0 = arith.constant 0 : i32
    %c0_i32_1 = arith.constant 0 : i32
    return %c0_i32, %c0_i32_0 : i32, i32
  }
  func.func @transform_2(%arg0: i32, %arg1: i32) -> (i32, i32) {
    %c0_i32 = arith.constant 0 : i32
    %c0_i32_0 = arith.constant 0 : i32
    %c0_i32_1 = arith.constant 0 : i32
    return %c0_i32, %c0_i32_0 : i32, i32
  }
  func.func @transform_3(%arg0: i32, %arg1: i32) -> (i32, i32) {
    %c0_i32 = arith.constant 0 : i32
    %c0_i32_0 = arith.constant 0 : i32
    %c0_i32_1 = arith.constant 0 : i32
    return %c0_i32, %c0_i32_0 : i32, i32
  }
  func.func @transform_4(%arg0: i32, %arg1: i32) -> (i32, i32) {
    %c0_i32 = arith.constant 0 : i32
    %c0_i32_0 = arith.constant 0 : i32
    %c0_i32_1 = arith.constant 0 : i32
    return %c0_i32, %c0_i32_0 : i32, i32
  }
  func.func @transform_5(%arg0: i32, %arg1: i32) -> (i32, i32) {
    %c0_i32 = arith.constant 0 : i32
    %c0_i32_0 = arith.constant 0 : i32
    %c0_i32_1 = arith.constant 0 : i32
    return %c0_i32, %c0_i32_0 : i32, i32
  }
  func.func @transform_6(%arg0: i32, %arg1: i32) -> (i32, i32) {
    %c0_i32 = arith.constant 0 : i32
    %c0_i32_0 = arith.constant 0 : i32
    %c0_i32_1 = arith.constant 0 : i32
    return %c0_i32, %c0_i32_0 : i32, i32
  }
  func.func @transform_7(%arg0: i32, %arg1: i32) -> (i32, i32, i32) {
    %c0_i32 = arith.constant 0 : i32
    %c0_i32_0 = arith.constant 0 : i32
    %c0_i32_1 = arith.constant 0 : i32
    return %arg0, %c0_i32, %c0_i32_0 : i32, i32, i32
  }
}

</mosaic_0001>

<bundles_post_ra>
// kernel: tpu_custom_call.1
= control target key start
LH: loop header
LB: loop body
LE: loop exit
PB: predicated region body
PF: predicated region fallthrough
CT: control target
= control target key end

     0   :  { %s2266_s0 = inlined_call_operand.vmem [shape: bf16[2,512,4], index: 0, kind: input, shape index: {}]   ;;  %s2267_s1 = inlined_call_operand.vmem [shape: bf16[4,128], index: 1, kind: input, shape index: {}]   ;;  %s2268_s2 = inlined_call_operand.vmem [shape: f32[1,128], index: 2, kind: input, shape index: {}]   ;;  %s2269_s3 = inlined_call_operand.vmem [shape: bf16[128,128], index: 3, kind: input, shape index: {}]   ;;  %s2270_s4 = inlined_call_operand.vmem [shape: f32[1,128], index: 4, kind: input, shape index: {}]   ;;  %s2271_s5 = inlined_call_operand.vmem [shape: bf16[128,128], index: 5, kind: input, shape index: {}]   ;;  %s2272_s6 = inlined_call_operand.vmem [shape: f32[1,128], index: 6, kind: input, shape index: {}]   ;;  %s2273_s7 = inlined_call_operand.hbm [shape: f32[2,1,128], index: 7, kind: output, shape index: {}]  }
   0x1   :  { %2274 = sst [smem:[#allocation6_spill]] %s2266_s0 }
   0x2   :  { %12 = vsyncpa [#allocation4], 0 }
   0x3   :  { %14 = vsyncpa [#allocation4 + $0x1], 0  ;;  %s1921_s24 = smov 0   ;;  %s1923_s25 = smov 0  }
   0x4   :  { %s1925_s26 = smov 0   ;;  %s1927_s27 = smov 0  }
   0x5   :  { %s1929_s28 = smov 0   ;;  %s1931_s29 = smov 0  }
   0x6   :  { %s1933_s30 = smov 0   ;;  %s1935_s8 = smov 0  }
   0x7 LB: > { %s1316_s9 = sadd.s32 4294967295, %s1873_s8   ;;  %s1317_s10 = sadd.s32 4294967294, %s1873_s8   ;;  %s1873_s8 = sphi %s1935_s8, %s20_s8   ;;  %s1869_s30 = sphi %s1933_s30, %s2284_s30   ;;  %s1865_s29 = sphi %s1931_s29, %s2283_s29   ;;  %s1861_s28 = sphi %s1929_s28, %s2282_s28   ;;  %s1857_s27 = sphi %s1927_s27, %s2281_s27   ;;  %s1853_s26 = sphi %s1925_s26, %s2280_s26   ;;  %s1849_s25 = sphi %s1923_s25, %s2279_s25   ;;  %s1845_s24 = sphi %s1921_s24, %s2278_s24  }
   0x8   : > { %s29_s11 = sadd.s32 1, %s1865_s29  ;;  %s32_s12 = sadd.s32 1, %s1869_s30 }
   0x9   : > { %p30_p0 = scmp.ge.s32.totalorder %s29_s11, 4  ;;  %p203_p1 = scmp.ne.s32.totalorder %s1853_s26, %s1849_s25 }
   0xa   : > { %p204_p2 = scmp.eq.s32.totalorder %s1316_s9, 7  ;;  %p209_p4 = scmp.ne.s32.totalorder %s1849_s25, %s1845_s24 }
   0xb   : > { %s2286_s11 = smov (%p30_p0, %s29_s11), 0  ;;  %s2288_s12 = smov (!%p30_p0, %s32_s12), %s1869_s30 }
   0xc   : > { %p1970_p3 = por %p204_p2, %p203_p1  ;;  %p34_p5 = scmp.ge.s32.totalorder %s2288_s12, 2 }
   0xd   : > { %p210_p6 = scmp.eq.s32.totalorder %s1317_s10, 7  ;;  %p1320_p7 = scmp.ge.s32.totalorder %s1873_s8, 1 }
   0xe   : > { %p259_p8 = scmp.lt.s32.totalorder %s1873_s8, 9  ;;  %s2290_s12 = smov (%p34_p5, %s2288_s12), 0 }
   0xf   : > { %p1980_p9 = por %p210_p6, %p209_p4  ;;  %s190_s15 = ssub.s32 %s1869_s30, %s2290_s12 }
  0x10   : > { %p260_p10 = pnand %p1320_p7, %p259_p8  ;;  %s193_s16 = sadd.s32 1, %s1853_s26 }
  0x11   : > { %p191_p11 = scmp.eq.s32.totalorder %s190_s15, 0  ;;  %s292_s18 = sand.u32 (!%p260_p10), 1, %s1849_s25  }
  0x12   : > { %263 = sbr.rel (%p260_p10) target bundleno = 800 (0x320), region = 48  ;;  %s1321_s19 = sshll.u32 (!%p260_p10), %s1857_s27, 4 }
  0x13   : > { %s1988_s17 = scalar_select %p191_p11, %s1853_s26, %s193_s16  }
  0x14   : > { %p295_p12 = scmp.lt.s32.totalorder (!%p260_p10), %s1861_s28, 1  ;;  %p297_p13 = scmp.lt.s32.totalorder (!%p260_p10), %s1321_s19, 63 }
  0x15   : > { %s2277_s0 = sld [smem:[#allocation6_spill]] (!%p260_p10)  ;;  %s2001_s16 = scalar_lea.vmem (!%p260_p10), [#allocation3], %s292_s18 }
  0x16   : > { %p1324_p0 = scmp.ne.s32.totalorder (!%p260_p10), %s1857_s27, 0 }
  0x19   : > { %s296_s20 = scalar_select %p295_p12, %s1861_s28, 1 }
  0x1a   : > { %s2292_s19 = smov (!%p297_p13, %s1321_s19), 63  ;;  %308 = sbr.rel (%p1324_p0) target bundleno = 33 (0x21), region = 52 }
  0x1b   : > { %s1322_s21 = sshll.u32 %s296_s20, 6  ;;  %v1875_v0 = vmov (!%p1324_p0), 0.0  }
  0x1c   : > { %s300_s22 = sadd.s32 %s1322_s21, %s2292_s19  ;;  %309 = vst [vmem:[#allocation2] sm:$0x1] (!%p1324_p0), %v1875_v0 }
  0x1d   : > { %s1323_s23 = sshll.u32 %s300_s22, 2 }
  0x1e   : > { %s1997_s15 = scalar_lea.vmem %s2277_s0, %s1323_s23 }
  0x21 PF: > { %v1349_v1 = vld [vmem:[%s1997_s15] sm:$0xff]   ;;  %v1380_v2 = vld [vmem:[%s1997_s15 + $0x8] sm:$0xff]   ;;  %v1876_v3 = vmov 1   ;;  %v1877_v4 = vmov 0   ;;  %v1382_v11 = vld [vmem:[%s1997_s15 + $0x18] sm:$0xff]   ;;  %v1878_v16 = vmov 2   ;;  %v424_v51 = vlaneseq }
  0x22   : > { %1588 = vset.pattern.permute.xlu1 %v1876_v3  ;;  %1577 = vset.pattern.permute.xlu0 %v1877_v4  ;;  %v1350_v5 = vunpack.c.l.bf16 %v1349_v1  ;;  %v1351_v6 = vunpack.c.h.bf16 %v1349_v1  ;;  %v1354_v7 = vunpack.c.l.bf16 %v1380_v2  ;;  %v1355_v8 = vunpack.c.h.bf16 %v1380_v2  ;;  %v1759_v12 = vld [vmem:[%s2269_s3] sm:$0xff]   ;;  %v1381_v15 = vld [vmem:[%s1997_s15 + $0x10] sm:$0xff]   ;;  %v1760_v17 = vld [vmem:[%s2269_s3 + $0x8] sm:$0xff]   ;;  %p1344_p1 = scmp.ne.s32.totalorder %s1857_s27, 3 }
  0x23   : > { %v1362_v13 = vunpack.c.l.bf16 %v1382_v11  ;;  %v1363_v14 = vunpack.c.h.bf16 %v1382_v11  ;;  %1419 = vmatprep.subr.bf16.mxu0 %v1759_v12  ;;  %v1358_v19 = vunpack.c.l.bf16 %v1381_v15  ;;  %v1359_v20 = vunpack.c.h.bf16 %v1381_v15  ;;  %v1384_v21 = vld [vmem:[%s1997_s15 + $0x28] sm:$0xff]   ;;  %v1761_v22 = vld [vmem:[%s2269_s3 + $0x10] sm:$0xff]   ;;  %v1762_v27 = vld [vmem:[%s2269_s3 + $0x18] sm:$0xff]  }
  0x24   : > { %v1589_v9 = vpack.i.bf16 %v1351_v6, %v1350_v5  ;;  %v1594_v10 = vpack.i.bf16 %v1355_v8, %v1354_v7  ;;  %1420 = vmatpush3.bf16.msra.mxu0 %v1759_v12  ;;  %v1879_v23 = vmov 3   ;;  %v1370_v25 = vunpack.c.l.bf16 %v1384_v21  ;;  %v1383_v29 = vld [vmem:[%s1997_s15 + $0x20] sm:$0xff]   ;;  %v1764_v33 = vld [vmem:[%s2269_s3 + $0x28] sm:$0xff]   ;;  %v1765_v35 = vld [vmem:[%s2269_s3 + $0x30] sm:$0xff]  }
  0x25   : > { %v1640_v18 = vpack.i.bf16 %v1363_v14, %v1362_v13  ;;  %1421 = vmatprep.subr.bf16.mxu0 %v1760_v17  ;;  %v1646_v24 = vpack.i.bf16 %v1359_v20, %v1358_v19  ;;  %v1371_v26 = vunpack.c.h.bf16 %v1384_v21  ;;  %v1763_v30 = vld [vmem:[%s2269_s3 + $0x20] sm:$0xff]   ;;  %v1366_v31 = vunpack.c.l.bf16 %v1383_v29  ;;  %v1386_v36 = vld [vmem:[%s1997_s15 + $0x38] sm:$0xff]   ;;  %v1385_v40 = vld [vmem:[%s1997_s15 + $0x30] sm:$0xff]  }
  0x26   : > { %1590 = vperm.xlu1 %1588, %v1589_v9   ;;  %1579 = vperm.xlu0 %1577, %v1589_v9   ;;  %v1367_v32 = vunpack.c.h.bf16 %v1383_v29  ;;  %v1378_v37 = vunpack.c.l.bf16 %v1386_v36  ;;  %v1379_v38 = vunpack.c.h.bf16 %v1386_v36  ;;  %v1766_v39 = vld [vmem:[%s2269_s3 + $0x38] sm:$0xff]   ;;  %v1374_v42 = vunpack.c.l.bf16 %v1385_v40  ;;  %v1767_v45 = vld [vmem:[%s2271_s5] sm:$0xff]   ;;  %v1768_v46 = vld [vmem:[%s2271_s5 + $0x8] sm:$0xff]  }
  0x27   : > { %v1674_v28 = vpack.i.bf16 %v1371_v26, %v1370_v25  ;;  %v1375_v43 = vunpack.c.h.bf16 %v1385_v40  ;;  %1451 = vmatprep.subr.bf16.mxu1 %v1767_v45  ;;  %v1769_v47 = vld [vmem:[%s2271_s5 + $0x10] sm:$0xff]   ;;  %v1770_v48 = vld [vmem:[%s2271_s5 + $0x18] sm:$0xff]   ;;  %v1771_v49 = vld [vmem:[%s2271_s5 + $0x20] sm:$0xff]   ;;  %v425_v52 = vshrl.u32 %v424_v51, 7 }
  0x28   : > { %1422 = vmatpush3.bf16.msra.mxu0 %v1760_v17  ;;  %v1696_v34 = vpack.i.bf16 %v1367_v32, %v1366_v31  ;;  %v1719_v41 = vpack.i.bf16 %v1379_v38, %v1378_v37  ;;  %1452 = vmatpush3.bf16.msra.mxu1 %v1767_v45  ;;  %v1772_v50 = vld [vmem:[%s2271_s5 + $0x28] sm:$0xff]   ;;  %v342_v53 = vld [vmem:[%s2267_s1] sm:$0x3] }
  0x29   : > { %1423 = vmatprep.subr.bf16.mxu0 %v1761_v22  ;;  %v1736_v44 = vpack.i.bf16 %v1375_v43, %v1374_v42  ;;  %1453 = vmatprep.subr.bf16.mxu1 %v1768_v46  ;;  %v343_v54 = vunpack.c.l.bf16 %v342_v53  ;;  %v426_v55 = vsub.s32 0, %v425_v52  ;;  %v533_v63 = vsub.s32 1, %v425_v52 }
  0x2a   : > { %1595 = vperm.xlu1 %1588, %v1594_v10   ;;  %1584 = vperm.xlu0 %1577, %v1594_v10   ;;  %v633_v0 = vsub.s32 2, %v425_v52 }
  0x2b   : > { %v2079_v58 = vrot.slane %v343_v54, %v426_v55  ;;  %v2088_v5 = vrot.slane %v343_v54, %v533_v63 }
  0x2c   : > { %1424 = vmatpush3.bf16.msra.mxu0 %v1761_v22  ;;  %1454 = vmatpush3.bf16.msra.mxu1 %v1768_v46  ;;  %v2090_v8 = vrot.slane %v343_v54, %v633_v0 }
  0x2d   : > { %1425 = vmatprep.subr.bf16.mxu0 %v1762_v27  ;;  %1455 = vmatprep.subr.bf16.mxu1 %v1769_v47 }
  0x2e   : > { %1605 = vset.pattern.permute.xlu1 %v1878_v16  ;;  %1599 = vset.pattern.permute.xlu0 %v1878_v16 }
  0x2f   : > { %1607 = vperm.xlu1 %1605, %v1594_v10   ;;  %1601 = vperm.xlu0 %1599, %v1589_v9  }
  0x30   : > { %1426 = vmatpush3.bf16.msra.mxu0 %v1762_v27  ;;  %1456 = vmatpush3.bf16.msra.mxu1 %v1769_v47 }
  0x31   : > { %1427 = vmatprep.subr.bf16.mxu0 %v1763_v30  ;;  %1457 = vmatprep.subr.bf16.mxu1 %v1770_v48 }
  0x33   : > { %1611 = vset.pattern.permute.xlu1 %v1879_v23  ;;  %1641 = vperm.xlu0 %1599, %v1640_v18  }
  0x34   : > { %1613 = vperm.xlu1 %1611, %v1589_v9   ;;  %1428 = vmatpush3.bf16.msra.mxu0 %v1763_v30 }
  0x35   : > { %1429 = vmatprep.subr.bf16.mxu0 %v1764_v33  ;;  %1458 = vmatpush3.bf16.msra.mxu1 %v1770_v48 }
  0x36   : > { %1459 = vmatprep.subr.bf16.mxu1 %v1771_v49 }
  0x37   : > { %1645 = vset.pattern.permute.xlu0 %v1876_v3 }
  0x38   : > { %1617 = vset.pattern.permute.xlu1 %v1877_v4  ;;  %1647 = vperm.xlu0 %1645, %v1646_v24  }
  0x39   : > { %1619 = vperm.xlu1 %1617, %v1646_v24   ;;  %1430 = vmatpush3.bf16.msra.mxu0 %v1764_v33 }
  0x3a   : > { %1431 = vmatprep.subr.bf16.mxu0 %v1765_v35  ;;  %1460 = vmatpush3.bf16.msra.mxu1 %v1771_v49 }
  0x3b   : > { %1461 = vmatprep.subr.bf16.mxu1 %v1772_v50 }
  0x3c   : > { %1675 = vperm.xlu0 %1645, %v1674_v28  }
  0x3d   : > { %1624 = vperm.xlu1 %1617, %v1640_v18   ;;  %1432 = vmatpush3.bf16.msra.mxu0 %v1765_v35 }
  0x3e   : > { %1433 = vmatprep.subr.bf16.mxu0 %v1766_v39  ;;  %1462 = vmatpush3.bf16.msra.mxu1 %v1772_v50 }
  0x40   : > { %1679 = vset.pattern.permute.xlu0 %v1879_v23 }
  0x41   : > { %1628 = vset.pattern.permute.xlu1 %v1876_v3  ;;  %1681 = vperm.xlu0 %1679, %v1594_v10  }
  0x42   : > { %1630 = vperm.xlu1 %1628, %v1640_v18   ;;  %1434 = vmatpush3.bf16.msra.mxu0 %v1766_v39 }
  0x45   : > { %1697 = vperm.xlu0 %1679, %v1696_v34  }
  0x46   : > { %1634 = vset.pattern.permute.xlu1 %v1878_v16 }
  0x47   : > { %1636 = vperm.xlu1 %1634, %v1646_v24  }
  0x49   : > { %1701 = vset.pattern.permute.xlu0 %v1877_v4 }
  0x4a   : > { %1703 = vperm.xlu0 %1701, %v1696_v34  }
  0x4b   : > { %1651 = vset.pattern.permute.xlu1 %v1879_v23 }
  0x4c   : > { %1653 = vperm.xlu1 %1651, %v1646_v24  }
  0x4e   : > { %1720 = vperm.xlu0 %1701, %v1719_v41  }
  0x50   : > { %1658 = vperm.xlu1 %1651, %v1640_v18  }
  0x52   : > { %1735 = vset.pattern.permute.xlu0 %v1878_v16 }
  0x53   : > { %1737 = vperm.xlu0 %1735, %v1736_v44  }
  0x54   : > { %1662 = vset.pattern.permute.xlu1 %v1877_v4 }
  0x55   : > { %1664 = vperm.xlu1 %1662, %v1674_v28  }
  0x57   : > { %1753 = vset.pattern.permute.xlu0 %v1879_v23 }
  0x58   : > { %1755 = vperm.xlu0 %1753, %v1719_v41  }
  0x59   : > { %1668 = vset.pattern.permute.xlu1 %v1876_v3 }
  0x5a   : > { %1670 = vperm.xlu1 %1668, %v1696_v34  }
  0x5e   : > { %1685 = vset.pattern.permute.xlu1 %v1878_v16 }
  0x5f   : > { %1687 = vperm.xlu1 %1685, %v1696_v34  }
  0x63   : > { %1692 = vperm.xlu1 %1685, %v1674_v28  }
  0x67   : > { %1707 = vset.pattern.permute.xlu1 %v1879_v23 }
  0x68   : > { %1709 = vperm.xlu1 %1707, %v1674_v28  }
  0x6c   : > { %1713 = vset.pattern.permute.xlu1 %v1877_v4  ;;  %v733_v4 = vsub.s32 3, %v425_v52 }
  0x6d   : > { %1715 = vperm.xlu1 %1713, %v1736_v44  }
  0x6e   : > { %v2094_v15 = vrot.slane %v343_v54, %v733_v4 }
  0x71   : > { %1724 = vset.pattern.permute.xlu1 %v1876_v3  ;;  %v2086_v3 = vld [vmem:[%s2268_s2] ss:$0 sm:$0xff] }
  0x72   : > { %1726 = vperm.xlu1 %1724, %v1736_v44  }
  0x76   : > { %1731 = vperm.xlu1 %1724, %v1719_v41  }
  0x7a   : > { %1741 = vset.pattern.permute.xlu1 %v1878_v16 }
  0x7b   : > { %1743 = vperm.xlu1 %1741, %v1719_v41  }
  0x7f   : > { %1747 = vset.pattern.permute.xlu1 %v1879_v23 }
  0x80   : > { %1749 = vperm.xlu1 %1747, %v1736_v44  }
  0xa5   : > { %v1591_v56 = vpop.permute.xlu1 %1590  ;;  %v1580_v57 = vpop.permute.xlu0 %1579 }
  0xa6   : > { %v1582_v59 = vunpack.i.h.bf16 %v1580_v57  ;;  %v1581_v60 = vunpack.i.l.bf16 %v1580_v57  ;;  %v1593_v6 = vunpack.i.h.bf16 %v1591_v56  ;;  %v1592_v7 = vunpack.i.l.bf16 %v1591_v56 }
  0xa8   : > { %v429_v1 = vmul.f32 %v1582_v59, %v2079_v58  ;;  %v428_v2 = vmul.f32 %v1581_v60, %v2079_v58  ;;  %v536_v16 = vmul.f32 %v1593_v6, %v2088_v5  ;;  %v535_v17 = vmul.f32 %v1592_v7, %v2088_v5 }
  0xa9   : > { %v1596_v61 = vpop.permute.xlu1 %1595  ;;  %v1585_v62 = vpop.permute.xlu0 %1584 }
  0xaa   : > { %v452_v11 = vadd.f32 %v2086_v3, %v429_v1  ;;  %v451_v12 = vadd.f32 %v2086_v3, %v428_v2  ;;  %v1587_v21 = vunpack.i.h.bf16 %v1585_v62  ;;  %v1586_v22 = vunpack.i.l.bf16 %v1585_v62 }
  0xab   : > { %v1598_v38 = vunpack.i.h.bf16 %v1596_v61  ;;  %v1597_v39 = vunpack.i.l.bf16 %v1596_v61 }
  0xac   : > { %v551_v26 = vadd.f32 %v535_v17, %v451_v12  ;;  %v552_v27 = vadd.f32 %v536_v16, %v452_v11  ;;  %v431_v32 = vmul.f32 %v1587_v21, %v2079_v58  ;;  %v430_v33 = vmul.f32 %v1586_v22, %v2079_v58 }
  0xad   : > { %v538_v49 = vmul.f32 %v1598_v38, %v2088_v5  ;;  %v537_v50 = vmul.f32 %v1597_v39, %v2088_v5 }
  0xae   : > { %v1608_v9 = vpop.permute.xlu1 %1607  ;;  %v1602_v10 = vpop.permute.xlu0 %1601  ;;  %v454_v42 = vadd.f32 %v2086_v3, %v431_v32  ;;  %v453_v43 = vadd.f32 %v2086_v3, %v430_v33 }
  0xaf   : > { %v1604_v13 = vunpack.i.h.bf16 %v1602_v10  ;;  %v1603_v14 = vunpack.i.l.bf16 %v1602_v10  ;;  %v1610_v44 = vunpack.i.h.bf16 %v1608_v9  ;;  %v1609_v45 = vunpack.i.l.bf16 %v1608_v9 }
  0xb0   : > { %v553_v52 = vadd.f32 %v537_v50, %v453_v43  ;;  %v554_v53 = vadd.f32 %v538_v49, %v454_v42 }
  0xb1   : > { %v636_v18 = vmul.f32 %v1604_v13, %v2090_v8  ;;  %v635_v19 = vmul.f32 %v1603_v14, %v2090_v8  ;;  %v638_v51 = vmul.f32 %v1610_v44, %v2090_v8  ;;  %v637_v54 = vmul.f32 %v1609_v45, %v2090_v8 }
  0xb2   : > { %v2100_v20 = vpop.permute.xlu0 %1641 }
  0xb3   : > { %v1614_v23 = vpop.permute.xlu1 %1613  ;;  %v651_v30 = vadd.f32 %v635_v19, %v551_v26  ;;  %v652_v31 = vadd.f32 %v636_v18, %v552_v27  ;;  %v653_v0 = vadd.f32 %v637_v54, %v553_v52  ;;  %v654_v1 = vadd.f32 %v638_v51, %v554_v53 }
  0xb4   : > { %v1616_v24 = vunpack.i.h.bf16 %v1614_v23  ;;  %v1615_v25 = vunpack.i.l.bf16 %v1614_v23  ;;  %v1644_v16 = vunpack.i.h.bf16 %v2100_v20 }
  0xb6   : > { %v736_v28 = vmul.f32 %v1616_v24, %v2094_v15  ;;  %v735_v29 = vmul.f32 %v1615_v25, %v2094_v15  ;;  %v642_v42 = vmul.f32 %v1644_v16, %v2090_v8 }
  0xb7   : > { %v1648_v34 = vpop.permute.xlu0 %1647 }
  0xb8   : > { %v1620_v35 = vpop.permute.xlu1 %1619  ;;  %v751_v36 = vadd.f32 %v735_v29, %v651_v30  ;;  %v752_v37 = vadd.f32 %v736_v28, %v652_v31  ;;  %v1650_v9 = vunpack.i.h.bf16 %v1648_v34  ;;  %v1649_v10 = vunpack.i.l.bf16 %v1648_v34 }
  0xb9   : > { %v1622_v55 = vunpack.i.h.bf16 %v1620_v35  ;;  %v1621_v56 = vunpack.i.l.bf16 %v1620_v35  ;;  %v1643_v29 = vunpack.i.l.bf16 %v2100_v20 }
  0xba   : > { %v767_v40 = vmax.f32 %v751_v36, 0.0  ;;  %v768_v41 = vmax.f32 %v752_v37, 0.0  ;;  %v540_v27 = vmul.f32 %v1650_v9, %v2088_v5  ;;  %v539_v28 = vmul.f32 %v1649_v10, %v2088_v5 }
  0xbb   : > { %v2108_v46 = vpop.permute.xlu0 %1675  ;;  %v433_v6 = vmul.f32 %v1622_v55, %v2079_v58  ;;  %v432_v7 = vmul.f32 %v1621_v56, %v2079_v58  ;;  %v641_v43 = vmul.f32 %v1643_v29, %v2090_v8 }
  0xbc   : > { %v1625_v47 = vpop.permute.xlu1 %1624  ;;  %v783_v48 = vpack.c.bf16 %v768_v41, %v767_v40  ;;  %v1677_v29 = vunpack.i.l.bf16 %v2108_v46 }
  0xbd   : > { %v1627_v62 = vunpack.i.h.bf16 %v1625_v47  ;;  %v1626_v63 = vunpack.i.l.bf16 %v1625_v47  ;;  %v456_v25 = vadd.f32 %v2086_v3, %v433_v6  ;;  %v455_v26 = vadd.f32 %v2086_v3, %v432_v7 }
  0xbe   : > { %1435 = vmatprep.mubr.bf16.mxu0 %v783_v48 }
  0xbf   : > { %v435_v17 = vmul.f32 %v1627_v62, %v2079_v58  ;;  %v434_v18 = vmul.f32 %v1626_v63, %v2079_v58  ;;  %v556_v38 = vadd.f32 %v540_v27, %v456_v25  ;;  %v555_v39 = vadd.f32 %v539_v28, %v455_v26 }
  0xc0   : > { %v1682_v57 = vpop.permute.xlu0 %1681  ;;  %v1678_v28 = vunpack.i.h.bf16 %v2108_v46 }
  0xc1   : > { %v1684_v59 = vunpack.i.h.bf16 %v1682_v57  ;;  %v1683_v60 = vunpack.i.l.bf16 %v1682_v57  ;;  %v1631_v61 = vpop.permute.xlu1 %1630  ;;  %v458_v35 = vadd.f32 %v2086_v3, %v435_v17  ;;  %v457_v36 = vadd.f32 %v2086_v3, %v434_v18 }
  0xc2   : > { %v1633_v13 = vunpack.i.h.bf16 %v1631_v61  ;;  %v1632_v14 = vunpack.i.l.bf16 %v1631_v61 }
  0xc3   : > { %v738_v2 = vmul.f32 %v1684_v59, %v2094_v15  ;;  %v737_v4 = vmul.f32 %v1683_v60, %v2094_v15 }
  0xc4   : > { %v542_v30 = vmul.f32 %v1633_v13, %v2088_v5  ;;  %v541_v31 = vmul.f32 %v1632_v14, %v2088_v5  ;;  %v1698_v20 = vpop.permute.xlu0 %1697 }
  0xc5   : > { %v753_v11 = vadd.f32 %v737_v4, %v653_v0  ;;  %v754_v12 = vadd.f32 %v738_v2, %v654_v1  ;;  %v1700_v18 = vunpack.i.h.bf16 %v1698_v20 }
  0xc6   : > { %v1637_v19 = vpop.permute.xlu1 %1636  ;;  %v557_v44 = vadd.f32 %v541_v31, %v457_v36  ;;  %v558_v45 = vadd.f32 %v542_v30, %v458_v35 }
  0xc7   : > { %v1639_v21 = vunpack.i.h.bf16 %v1637_v19  ;;  %v1638_v22 = vunpack.i.l.bf16 %v1637_v19  ;;  %v769_v23 = vmax.f32 %v753_v11, 0.0  ;;  %v770_v24 = vmax.f32 %v754_v12, 0.0 }
  0xc8   : > { %v657_v56 = vadd.f32 %v641_v43, %v557_v44  ;;  %v658_v57 = vadd.f32 %v642_v42, %v558_v45  ;;  %v1699_v19 = vunpack.i.l.bf16 %v1698_v20  ;;  %v546_v43 = vmul.f32 %v1678_v28, %v2088_v5 }
  0xc9   : > { %v784_v32 = vpack.c.bf16 %v770_v24, %v769_v23  ;;  %v640_v33 = vmul.f32 %v1639_v21, %v2090_v8  ;;  %v639_v34 = vmul.f32 %v1638_v22, %v2090_v8  ;;  %v1704_v63 = vpop.permute.xlu0 %1703  ;;  %v545_v44 = vmul.f32 %v1677_v29, %v2088_v5 }
  0xca   : > { %v1706_v6 = vunpack.i.h.bf16 %v1704_v63  ;;  %v1705_v7 = vunpack.i.l.bf16 %v1704_v63 }
  0xcb   : > { %v1654_v37 = vpop.permute.xlu1 %1653  ;;  %1436 = vmatmul.mubr.bf16.vlgmr.msra.gmra.mrb[0].mxu0 %v784_v32  ;;  %v655_v47 = vadd.f32 %v639_v34, %v555_v39  ;;  %v656_v48 = vadd.f32 %v640_v33, %v556_v38  ;;  %v744_v32 = vmul.f32 %v1700_v18, %v2094_v15  ;;  %v743_v33 = vmul.f32 %v1699_v19, %v2094_v15 }
  0xcc   : > { %v1656_v40 = vunpack.i.h.bf16 %v1654_v37  ;;  %v1655_v41 = vunpack.i.l.bf16 %v1654_v37  ;;  %v437_v12 = vmul.f32 %v1706_v6, %v2079_v58  ;;  %v436_v13 = vmul.f32 %v1705_v7, %v2079_v58 }
  0xce   : > { %v740_v49 = vmul.f32 %v1656_v40, %v2094_v15  ;;  %v739_v50 = vmul.f32 %v1655_v41, %v2094_v15  ;;  %v460_v23 = vadd.f32 %v2086_v3, %v437_v12  ;;  %v459_v24 = vadd.f32 %v2086_v3, %v436_v13 }
  0xcf   : > { %v1659_v51 = vpop.permute.xlu1 %1658 }
  0xd0   : > { %v755_v52 = vadd.f32 %v739_v50, %v655_v47  ;;  %v756_v53 = vadd.f32 %v740_v49, %v656_v48  ;;  %v1661_v54 = vunpack.i.h.bf16 %v1659_v51  ;;  %v1660_v55 = vunpack.i.l.bf16 %v1659_v51 }
  0xd2   : > { %v742_v59 = vmul.f32 %v1661_v54, %v2094_v15  ;;  %v741_v60 = vmul.f32 %v1660_v55, %v2094_v15  ;;  %v771_v61 = vmax.f32 %v755_v52, 0.0  ;;  %v772_v62 = vmax.f32 %v756_v53, 0.0 }
  0xd4   : > { %v757_v0 = vadd.f32 %v741_v60, %v657_v56  ;;  %v758_v1 = vadd.f32 %v742_v59, %v658_v57  ;;  %v1665_v2 = vpop.permute.xlu1 %1664  ;;  %v785_v4 = vpack.c.bf16 %v772_v62, %v771_v61 }
  0xd5   : > { %v1667_v21 = vunpack.i.h.bf16 %v1665_v2  ;;  %v1666_v22 = vunpack.i.l.bf16 %v1665_v2 }
  0xd6   : > { %1439 = vmatprep.mubr.bf16.mxu0 %v785_v4  ;;  %v773_v9 = vmax.f32 %v757_v0, 0.0  ;;  %v774_v10 = vmax.f32 %v758_v1, 0.0  ;;  %v1721_v1 = vpop.permute.xlu0 %1720 }
  0xd7   : > { %v439_v34 = vmul.f32 %v1667_v21, %v2079_v58  ;;  %v438_v35 = vmul.f32 %v1666_v22, %v2079_v58  ;;  %v1723_v13 = vunpack.i.h.bf16 %v1721_v1 }
  0xd8   : > { %v786_v11 = vpack.c.bf16 %v774_v10, %v773_v9 }
  0xd9   : > { %v1671_v14 = vpop.permute.xlu1 %1670  ;;  %v462_v45 = vadd.f32 %v2086_v3, %v439_v34  ;;  %v461_v47 = vadd.f32 %v2086_v3, %v438_v35 }
  0xda   : > { %v1673_v16 = vunpack.i.h.bf16 %v1671_v14  ;;  %v1672_v17 = vunpack.i.l.bf16 %v1671_v14  ;;  %1440 = vmatmul.mubr.bf16.gmra.mrb[4].mxu0 %v786_v11  ;;  %v1738_v12 = vpop.permute.xlu0 %1737  ;;  %v1722_v14 = vunpack.i.l.bf16 %v1721_v1 }
  0xdb   : > { %v561_v55 = vadd.f32 %v545_v44, %v461_v47  ;;  %v562_v56 = vadd.f32 %v546_v43, %v462_v45  ;;  %v1740_v35 = vunpack.i.h.bf16 %v1738_v12 }
  0xdc   : > { %v544_v25 = vmul.f32 %v1673_v16, %v2088_v5  ;;  %v543_v26 = vmul.f32 %v1672_v17, %v2088_v5 }
  0xde   : > { %v1688_v27 = vpop.permute.xlu1 %1687  ;;  %v559_v36 = vadd.f32 %v543_v26, %v459_v24  ;;  %v560_v37 = vadd.f32 %v544_v25, %v460_v23  ;;  %v1756_v19 = vpop.permute.xlu0 %1755  ;;  %v443_v25 = vmul.f32 %v1723_v13, %v2079_v58  ;;  %v442_v26 = vmul.f32 %v1722_v14, %v2079_v58 }
  0xdf   : > { %v1690_v30 = vunpack.i.h.bf16 %v1688_v27  ;;  %v1689_v31 = vunpack.i.l.bf16 %v1688_v27  ;;  %v1758_v29 = vunpack.i.h.bf16 %v1756_v19 }
  0xe1   : > { %v644_v38 = vmul.f32 %v1690_v30, %v2090_v8  ;;  %v643_v39 = vmul.f32 %v1689_v31, %v2090_v8  ;;  %v1757_v30 = vunpack.i.l.bf16 %v1756_v19 }
  0xe2   : > { %v1693_v40 = vpop.permute.xlu1 %1692 }
  0xe3   : > { %v659_v41 = vadd.f32 %v643_v39, %v559_v36  ;;  %v660_v20 = vadd.f32 %v644_v38, %v560_v37  ;;  %v1695_v46 = vunpack.i.h.bf16 %v1693_v40  ;;  %v1694_v42 = vunpack.i.l.bf16 %v1693_v40 }
  0xe4   : > { %v1739_v36 = vunpack.i.l.bf16 %v1738_v12  ;;  %v466_v38 = vadd.f32 %v2086_v3, %v443_v25  ;;  %v465_v39 = vadd.f32 %v2086_v3, %v442_v26 }
  0xe5   : > { %v759_v48 = vadd.f32 %v743_v33, %v659_v41  ;;  %v760_v49 = vadd.f32 %v744_v32, %v660_v20  ;;  %v646_v50 = vmul.f32 %v1695_v46, %v2090_v8  ;;  %v645_v51 = vmul.f32 %v1694_v42, %v2090_v8 }
  0xe6   : > { %v750_v46 = vmul.f32 %v1758_v29, %v2094_v15  ;;  %v749_v42 = vmul.f32 %v1757_v30, %v2094_v15 }
  0xe7   : > { %v1710_v52 = vpop.permute.xlu1 %1709  ;;  %v775_v53 = vmax.f32 %v759_v48, 0.0  ;;  %v776_v54 = vmax.f32 %v760_v49, 0.0  ;;  %v661_v61 = vadd.f32 %v645_v51, %v561_v55  ;;  %v662_v62 = vadd.f32 %v646_v50, %v562_v56 }
  0xe8   : > { %v1712_v57 = vunpack.i.h.bf16 %v1710_v52  ;;  %v1711_v59 = vunpack.i.l.bf16 %v1710_v52  ;;  %v648_v49 = vmul.f32 %v1740_v35, %v2090_v8  ;;  %v647_v50 = vmul.f32 %v1739_v36, %v2090_v8 }
  0xe9   : > { %v787_v60 = vpack.c.bf16 %v776_v54, %v775_v53 }
  0xea   : > { %v746_v63 = vmul.f32 %v1712_v57, %v2094_v15  ;;  %v745_v0 = vmul.f32 %v1711_v59, %v2094_v15 }
  0xeb   : > { %1443 = vmatprep.mubr.bf16.mxu0 %v787_v60 }
  0xec   : > { %v761_v2 = vadd.f32 %v745_v0, %v661_v61  ;;  %v762_v4 = vadd.f32 %v746_v63, %v662_v62  ;;  %v1716_v6 = vpop.permute.xlu1 %1715 }
  0xed   : > { %v1718_v16 = vunpack.i.h.bf16 %v1716_v6  ;;  %v1717_v17 = vunpack.i.l.bf16 %v1716_v6 }
  0xee   : > { %v777_v7 = vmax.f32 %v761_v2, 0.0  ;;  %v778_v9 = vmax.f32 %v762_v4, 0.0 }
  0xef   : > { %v441_v27 = vmul.f32 %v1718_v16, %v2079_v58  ;;  %v440_v28 = vmul.f32 %v1717_v17, %v2079_v58 }
  0xf0   : > { %v788_v10 = vpack.c.bf16 %v778_v9, %v777_v7  ;;  %v1773_v7 = vld [vmem:[%s2271_s5 + $0x30] sm:$0xff]   ;;  %v1326_v9 = vld [vmem:[%s2270_s4] ss:$0 sm:$0xff] }
  0xf1   : > { %v1727_v11 = vpop.permute.xlu1 %1726  ;;  %v464_v58 = vadd.f32 %v2086_v3, %v441_v27  ;;  %v463_v20 = vadd.f32 %v2086_v3, %v440_v28  ;;  %1463 = vmatprep.subr.bf16.mxu1 %v1773_v7 }
  0xf2   : > { %1444 = vmatmul.mubr.bf16.gmra.mrb[8].mxu0 %v788_v10  ;;  %v1729_v21 = vunpack.i.h.bf16 %v1727_v11  ;;  %v1728_v22 = vunpack.i.l.bf16 %v1727_v11  ;;  %1464 = vmatpush3.bf16.msra.mxu1 %v1773_v7 }
  0xf4   : > { %v548_v33 = vmul.f32 %v1729_v21, %v2088_v5  ;;  %v547_v34 = vmul.f32 %v1728_v22, %v2088_v5 }
  0xf5   : > { %v1732_v18 = vpop.permute.xlu1 %1731 }
  0xf6   : > { %v1734_v23 = vunpack.i.h.bf16 %v1732_v18  ;;  %v1733_v24 = vunpack.i.l.bf16 %v1732_v18  ;;  %v563_v47 = vadd.f32 %v547_v34, %v463_v20  ;;  %v564_v48 = vadd.f32 %v548_v33, %v464_v58 }
  0xf8   : > { %v550_v31 = vmul.f32 %v1734_v23, %v2088_v5  ;;  %v549_v32 = vmul.f32 %v1733_v24, %v2088_v5  ;;  %v664_v57 = vadd.f32 %v648_v49, %v564_v48  ;;  %v663_v59 = vadd.f32 %v647_v50, %v563_v47 }
  0xfa   : > { %v1744_v37 = vpop.permute.xlu1 %1743  ;;  %v565_v43 = vadd.f32 %v549_v32, %v465_v39  ;;  %v566_v44 = vadd.f32 %v550_v31, %v466_v38 }
  0xfb   : > { %v1746_v40 = vunpack.i.h.bf16 %v1744_v37  ;;  %v1745_v41 = vunpack.i.l.bf16 %v1744_v37 }
  0xfd   : > { %v650_v5 = vmul.f32 %v1746_v40, %v2090_v8  ;;  %v649_v45 = vmul.f32 %v1745_v41, %v2090_v8 }
  0xff   : > { %v665_v51 = vadd.f32 %v649_v45, %v565_v43  ;;  %v666_v52 = vadd.f32 %v650_v5, %v566_v44  ;;  %v1750_v53 = vpop.permute.xlu1 %1749 }
 0x100   : > { %v1752_v3 = vunpack.i.h.bf16 %v1750_v53  ;;  %v1751_v54 = vunpack.i.l.bf16 %v1750_v53 }
 0x101   : > { %v765_v55 = vadd.f32 %v749_v42, %v665_v51  ;;  %v766_v56 = vadd.f32 %v750_v46, %v666_v52 }
 0x102   : > { %v748_v60 = vmul.f32 %v1752_v3, %v2094_v15  ;;  %v747_v61 = vmul.f32 %v1751_v54, %v2094_v15  ;;  %v1774_v15 = vld [vmem:[%s2271_s5 + $0x38] sm:$0xff]  }
 0x103   : > { %v781_v0 = vmax.f32 %v765_v55, 0.0  ;;  %v782_v1 = vmax.f32 %v766_v56, 0.0  ;;  %1465 = vmatprep.subr.bf16.mxu1 %v1774_v15 }
 0x104   : > { %v763_v62 = vadd.f32 %v747_v61, %v663_v59  ;;  %v764_v63 = vadd.f32 %v748_v60, %v664_v57  ;;  %1466 = vmatpush3.bf16.msra.mxu1 %v1774_v15 }
 0x105   : > { %v790_v6 = vpack.c.bf16 %v782_v1, %v781_v0  ;;  %v2192_v1 = vld [vmem:[%s2272_s6] ss:$0 sm:$0xff] }
 0x106   : > { %v779_v2 = vmax.f32 %v763_v62, 0.0  ;;  %v780_v4 = vmax.f32 %v764_v63, 0.0 }
 0x108   : > { %v789_v8 = vpack.c.bf16 %v780_v4, %v779_v2 }
 0x10a   : > { %1447 = vmatprep.mubr.bf16.mxu0 %v789_v8 }
 0x10b   : > { %1448 = vmatmul.mubr.bf16.gmra.mrb[12].mxu0 %v790_v6 }
 0x19e   : > { %v1437_v10 = vpop.f32.mrb[0].mxu0 }
 0x19f   : > { %v905_v11 = vadd.f32 %v1437_v10, %v1326_v9  ;;  %v896_v12 = vpop.f32.mrb[1].mxu0 }
 0x1a0   : > { %v897_v13 = vadd.f32 %v1326_v9, %v896_v12  ;;  %v1438_v14 = vpop.f32.mrb[2].mxu0 }
 0x1a1   : > { %v908_v16 = vadd.f32 %v1438_v14, %v1326_v9  ;;  %v899_v17 = vpop.f32.mrb[3].mxu0  ;;  %v961_v19 = vmax.f32 %v905_v11, 0.0 }
 0x1a2   : > { %v900_v18 = vadd.f32 %v1326_v9, %v899_v17  ;;  %v959_v22 = vmax.f32 %v897_v13, 0.0 }
 0x1a3   : > { %v962_v21 = vmax.f32 %v908_v16, 0.0 }
 0x1a4   : > { %v960_v23 = vmax.f32 %v900_v18, 0.0 }
 0x1a5   : > { %v976_v24 = vpack.c.bf16 %v962_v21, %v961_v19 }
 0x1a6   : > { %v975_v25 = vpack.c.bf16 %v960_v23, %v959_v22 }
 0x1a8   : > { %1467 = vmatprep.mubr.bf16.mxu1 %v975_v25 }
 0x1a9   : > { %1468 = vmatmul.mubr.bf16.vlgmr.msra.gmra.mrb[0].mxu1 %v976_v24 }
 0x1ad   : > { %v1441_v26 = vpop.f32.mrb[4].mxu0 }
 0x1ae   : > { %v921_v27 = vadd.f32 %v1441_v26, %v1326_v9  ;;  %v912_v28 = vpop.f32.mrb[5].mxu0 }
 0x1af   : > { %v913_v29 = vadd.f32 %v1326_v9, %v912_v28  ;;  %v1442_v30 = vpop.f32.mrb[6].mxu0 }
 0x1b0   : > { %v924_v31 = vadd.f32 %v1442_v30, %v1326_v9  ;;  %v915_v32 = vpop.f32.mrb[7].mxu0  ;;  %v965_v34 = vmax.f32 %v921_v27, 0.0 }
 0x1b1   : > { %v916_v33 = vadd.f32 %v1326_v9, %v915_v32  ;;  %v963_v36 = vmax.f32 %v913_v29, 0.0 }
 0x1b2   : > { %v966_v35 = vmax.f32 %v924_v31, 0.0 }
 0x1b3   : > { %v964_v37 = vmax.f32 %v916_v33, 0.0 }
 0x1b4   : > { %v978_v38 = vpack.c.bf16 %v966_v35, %v965_v34 }
 0x1b5   : > { %v977_v39 = vpack.c.bf16 %v964_v37, %v963_v36 }
 0x1b7   : > { %1471 = vmatprep.mubr.bf16.mxu1 %v977_v39 }
 0x1b8   : > { %1472 = vmatmul.mubr.bf16.gmra.mrb[4].mxu1 %v978_v38 }
 0x1c5   : > { %v1445_v40 = vpop.f32.mrb[8].mxu0 }
 0x1c6   : > { %v937_v41 = vadd.f32 %v1445_v40, %v1326_v9  ;;  %v928_v58 = vpop.f32.mrb[9].mxu0 }
 0x1c7   : > { %v929_v20 = vadd.f32 %v1326_v9, %v928_v58  ;;  %v1446_v46 = vpop.f32.mrb[10].mxu0 }
 0x1c8   : > { %v940_v42 = vadd.f32 %v1446_v46, %v1326_v9  ;;  %v931_v43 = vpop.f32.mrb[11].mxu0  ;;  %v969_v5 = vmax.f32 %v937_v41, 0.0 }
 0x1c9   : > { %v932_v44 = vadd.f32 %v1326_v9, %v931_v43  ;;  %v967_v47 = vmax.f32 %v929_v20, 0.0 }
 0x1ca   : > { %v970_v45 = vmax.f32 %v940_v42, 0.0 }
 0x1cb   : > { %v968_v48 = vmax.f32 %v932_v44, 0.0 }
 0x1cc   : > { %v980_v49 = vpack.c.bf16 %v970_v45, %v969_v5 }
 0x1cd   : > { %v979_v50 = vpack.c.bf16 %v968_v48, %v967_v47 }
 0x1cf   : > { %1475 = vmatprep.mubr.bf16.mxu1 %v979_v50 }
 0x1d0   : > { %1476 = vmatmul.mubr.bf16.gmra.mrb[8].mxu1 %v980_v49 }
 0x1de   : > { %v1449_v51 = vpop.f32.mrb[12].mxu0 }
 0x1df   : > { %v953_v52 = vadd.f32 %v1449_v51, %v1326_v9  ;;  %v944_v53 = vpop.f32.mrb[13].mxu0 }
 0x1e0   : > { %v945_v3 = vadd.f32 %v1326_v9, %v944_v53  ;;  %v1450_v54 = vpop.f32.mrb[14].mxu0 }
 0x1e1   : > { %v956_v55 = vadd.f32 %v1450_v54, %v1326_v9  ;;  %v947_v56 = vpop.f32.mrb[15].mxu0  ;;  %v973_v59 = vmax.f32 %v953_v52, 0.0 }
 0x1e2   : > { %v948_v57 = vadd.f32 %v1326_v9, %v947_v56  ;;  %v971_v61 = vmax.f32 %v945_v3, 0.0 }
 0x1e3   : > { %v974_v60 = vmax.f32 %v956_v55, 0.0 }
 0x1e4   : > { %v972_v62 = vmax.f32 %v948_v57, 0.0 }
 0x1e5   : > { %v982_v63 = vpack.c.bf16 %v974_v60, %v973_v59 }
 0x1e6   : > { %v981_v0 = vpack.c.bf16 %v972_v62, %v971_v61 }
 0x1e8   : > { %1479 = vmatprep.mubr.bf16.mxu1 %v981_v0 }
 0x1e9   : > { %1480 = vmatmul.mubr.bf16.gmra.mrb[12].mxu1 %v982_v63 }
 0x27c   : > { %v1469_v2 = vpop.f32.mrb[0].mxu1 }
 0x27d   : > { %v1097_v4 = vadd.f32 %v1469_v2, %v2192_v1  ;;  %v1088_v8 = vpop.f32.mrb[1].mxu1 }
 0x27e   : > { %v1089_v6 = vadd.f32 %v2192_v1, %v1088_v8  ;;  %v1470_v7 = vpop.f32.mrb[2].mxu1 }
 0x27f   : > { %v1100_v15 = vadd.f32 %v1470_v7, %v2192_v1  ;;  %v1091_v9 = vpop.f32.mrb[3].mxu1  ;;  %v1153_v10 = vmax.f32 %v1097_v4, 1e-06 }
 0x280   : > { %v1151_v11 = vmax.f32 %v1089_v6, 1e-06  ;;  %v1092_v12 = vadd.f32 %v2192_v1, %v1091_v9 }
 0x281   : > { %v1154_v14 = vmax.f32 %v1100_v15, 1e-06  ;;  %v1169_v17 = vmul.f32 %v1153_v10, %v1153_v10 }
 0x282   : > { %v1167_v13 = vmul.f32 %v1151_v11, %v1151_v11  ;;  %v1152_v16 = vmax.f32 %v1092_v12, 1e-06 }
 0x283   : > { %v1170_v21 = vmul.f32 %v1154_v14, %v1154_v14  ;;  %v1185_v23 = vmul.f32 %v1169_v17, %v1153_v10 }
 0x284   : > { %v1168_v18 = vmul.f32 %v1152_v16, %v1152_v16  ;;  %v1183_v19 = vmul.f32 %v1167_v13, %v1151_v11 }
 0x285   : > { %v1186_v25 = vmul.f32 %v1170_v21, %v1154_v14 }
 0x286   : > { %v1184_v22 = vmul.f32 %v1168_v18, %v1152_v16 }
 0x288   : > { %v1200_v24 = vadd.f32 %v1184_v22, %v1183_v19 }
 0x28a   : > { %v1201_v26 = vadd.f32 %v1200_v24, %v1185_v23 }
 0x28b   : > { %v1473_v27 = vpop.f32.mrb[4].mxu1 }
 0x28c   : > { %v1113_v28 = vadd.f32 %v1473_v27, %v2192_v1  ;;  %v1104_v29 = vpop.f32.mrb[5].mxu1  ;;  %v1202_v30 = vadd.f32 %v1201_v26, %v1186_v25 }
 0x28d   : > { %v1105_v31 = vadd.f32 %v2192_v1, %v1104_v29  ;;  %v1474_v32 = vpop.f32.mrb[6].mxu1 }
 0x28e   : > { %v1116_v33 = vadd.f32 %v1474_v32, %v2192_v1  ;;  %v1107_v34 = vpop.f32.mrb[7].mxu1  ;;  %v1157_v35 = vmax.f32 %v1113_v28, 1e-06 }
 0x28f   : > { %v1155_v36 = vmax.f32 %v1105_v31, 1e-06  ;;  %v1108_v37 = vadd.f32 %v2192_v1, %v1107_v34 }
 0x290   : > { %v1158_v39 = vmax.f32 %v1116_v33, 1e-06  ;;  %v1173_v41 = vmul.f32 %v1157_v35, %v1157_v35 }
 0x291   : > { %v1171_v38 = vmul.f32 %v1155_v36, %v1155_v36  ;;  %v1156_v40 = vmax.f32 %v1108_v37, 1e-06 }
 0x292   : > { %v1174_v42 = vmul.f32 %v1158_v39, %v1158_v39  ;;  %v1189_v44 = vmul.f32 %v1173_v41, %v1157_v35 }
 0x293   : > { %v1187_v58 = vmul.f32 %v1171_v38, %v1155_v36  ;;  %v1172_v20 = vmul.f32 %v1156_v40, %v1156_v40 }
 0x294   : > { %v1190_v45 = vmul.f32 %v1174_v42, %v1158_v39 }
 0x295   : > { %v1203_v46 = vadd.f32 %v1202_v30, %v1187_v58  ;;  %v1188_v43 = vmul.f32 %v1172_v20, %v1156_v40 }
 0x297   : > { %v1204_v5 = vadd.f32 %v1203_v46, %v1188_v43 }
 0x299   : > { %v1205_v47 = vadd.f32 %v1204_v5, %v1189_v44 }
 0x29b   : > { %v1206_v48 = vadd.f32 %v1205_v47, %v1190_v45 }
 0x2a3   : > { %v1477_v49 = vpop.f32.mrb[8].mxu1 }
 0x2a4   : > { %v1129_v50 = vadd.f32 %v1477_v49, %v2192_v1  ;;  %v1120_v51 = vpop.f32.mrb[9].mxu1 }
 0x2a5   : > { %v1121_v52 = vadd.f32 %v2192_v1, %v1120_v51  ;;  %v1478_v53 = vpop.f32.mrb[10].mxu1 }
 0x2a6   : > { %v1132_v3 = vadd.f32 %v1478_v53, %v2192_v1  ;;  %v1123_v54 = vpop.f32.mrb[11].mxu1  ;;  %v1161_v55 = vmax.f32 %v1129_v50, 1e-06 }
 0x2a7   : > { %v1159_v56 = vmax.f32 %v1121_v52, 1e-06  ;;  %v1124_v57 = vadd.f32 %v2192_v1, %v1123_v54 }
 0x2a8   : > { %v1162_v60 = vmax.f32 %v1132_v3, 1e-06  ;;  %v1177_v62 = vmul.f32 %v1161_v55, %v1161_v55 }
 0x2a9   : > { %v1175_v59 = vmul.f32 %v1159_v56, %v1159_v56  ;;  %v1160_v61 = vmax.f32 %v1124_v57, 1e-06 }
 0x2aa   : > { %v1178_v4 = vmul.f32 %v1162_v60, %v1162_v60  ;;  %v1193_v6 = vmul.f32 %v1177_v62, %v1161_v55 }
 0x2ab   : > { %v1191_v63 = vmul.f32 %v1175_v59, %v1159_v56  ;;  %v1176_v0 = vmul.f32 %v1160_v61, %v1160_v61 }
 0x2ac   : > { %v1194_v15 = vmul.f32 %v1178_v4, %v1162_v60 }
 0x2ad   : > { %v1207_v2 = vadd.f32 %v1206_v48, %v1191_v63  ;;  %v1192_v8 = vmul.f32 %v1176_v0, %v1160_v61 }
 0x2af   : > { %v1208_v7 = vadd.f32 %v1207_v2, %v1192_v8 }
 0x2b1   : > { %v1209_v9 = vadd.f32 %v1208_v7, %v1193_v6 }
 0x2b3   : > { %v1210_v10 = vadd.f32 %v1209_v9, %v1194_v15 }
 0x2bc   : > { %v1481_v11 = vpop.f32.mrb[12].mxu1 }
 0x2bd   : > { %v1145_v12 = vadd.f32 %v1481_v11, %v2192_v1  ;;  %v1136_v13 = vpop.f32.mrb[13].mxu1 }
 0x2be   : > { %v1137_v14 = vadd.f32 %v2192_v1, %v1136_v13  ;;  %v1482_v16 = vpop.f32.mrb[14].mxu1 }
 0x2bf   : > { %v1148_v17 = vadd.f32 %v1482_v16, %v2192_v1  ;;  %v1139_v18 = vpop.f32.mrb[15].mxu1  ;;  %v1165_v19 = vmax.f32 %v1145_v12, 1e-06 }
 0x2c0   : > { %v1163_v21 = vmax.f32 %v1137_v14, 1e-06  ;;  %v1140_v22 = vadd.f32 %v2192_v1, %v1139_v18  ;;  %v1199_v1 = vld [vmem:[#allocation2] sm:$0x1] }
 0x2c1   : > { %v1166_v24 = vmax.f32 %v1148_v17, 1e-06  ;;  %v1181_v26 = vmul.f32 %v1165_v19, %v1165_v19 }
 0x2c2   : > { %v1179_v23 = vmul.f32 %v1163_v21, %v1163_v21  ;;  %v1164_v25 = vmax.f32 %v1140_v22, 1e-06 }
 0x2c3   : > { %v1182_v30 = vmul.f32 %v1166_v24, %v1166_v24  ;;  %v1197_v32 = vmul.f32 %v1181_v26, %v1165_v19 }
 0x2c4   : > { %v1195_v27 = vmul.f32 %v1179_v23, %v1163_v21  ;;  %v1180_v28 = vmul.f32 %v1164_v25, %v1164_v25 }
 0x2c5   : > { %v1198_v34 = vmul.f32 %v1182_v30, %v1166_v24 }
 0x2c6   : > { %v1211_v29 = vadd.f32 %v1210_v10, %v1195_v27  ;;  %v1196_v31 = vmul.f32 %v1180_v28, %v1164_v25 }
 0x2c8   : > { %v1212_v33 = vadd.f32 %v1211_v29, %v1196_v31 }
 0x2ca   : > { %v1213_v35 = vadd.f32 %v1212_v33, %v1197_v32 }
 0x2cc   : > { %v1214_v36 = vadd.f32 %v1213_v35, %v1198_v34 }
 0x2ce   : > { %v1215_v37 = vrot.slane %v1214_v36, 4 }
 0x2d0   : > { %v1216_v38 = vadd.f32 %v1215_v37, %v1214_v36 }
 0x2d2   : > { %v1217_v39 = vrot.slane %v1216_v38, 2 }
 0x2d4   : > { %v1218_v40 = vadd.f32 %v1217_v39, %v1216_v38 }
 0x2d6   : > { %v1219_v41 = vrot.slane %v1218_v40, 1  ;;  %1226 = sbr.rel (%p1344_p1) target bundleno = 776 (0x308), region = 56 }
 0x2d8   : > { %v1220_v58 = vadd.f32 %v1219_v41, %v1218_v40 }
 0x2da   : > { %v1221_v20 = vadd.f32 %v1220_v58, %v1199_v1 }
 0x2dc   : > { %1222 = vst [vmem:[#allocation2] sm:$0x1] %v1221_v20 }
 0x2e3   : > { %v1227_v46 = vld [vmem:[#allocation2] sm:$0x1] }
 0x2e4   : > { %v1228_v42 = vmul.f32 0.001953125, %v1227_v46 }
 0x2e6   : > { %v1485_v43 = vand.u32 2147483647, %v1228_v42  ;;  %v1489_v45 = vand.u32 2147483648, %v1228_v42  ;;  %vm1484_vm2 = vcmp.lt.f32.partialorder %v1228_v42, 0.0  ;;  %vm1483_vm3 = vcmp.eq.f32.partialorder %v1228_v42, 0.0 }
 0x2e8   : > { %1775 = vlog2.f32 %v1485_v43  ;;  %vm1493_vm0 = vweird.f32 %v1485_v43  ;;  %vm1495_vm1 = vcmp.eq.f32.partialorder %v1485_v43, 0.0  ;;  %vm1486_vm4 = vcmp.eq.f32.partialorder %v1485_v43, inf }
 0x2f2   : > { %v1776_v44 = vpop.eup %1775 }
 0x2f3   : > { %v1490_v5 = vmul.f32 0.33333334, %v1776_v44 }
 0x2f5   : > { %1777 = vpow2.f32 %v1490_v5 }
 0x2ff   : > { %v1778_v47 = vpop.eup %1777 }
 0x300   : > { %v1492_v48 = vor.u32 %v1778_v47, %v1489_v45 }
 0x302   : > { %v1494_v49 = vsel %vm1493_vm0, %v1228_v42, %v1492_v48 }
 0x303   : > { %v1497_v50 = vsel %vm1495_vm1, %v1489_v45, %v1494_v49 }
 0x304   : > { %v1498_v51 = vsel %vm1484_vm2, nan, %v1497_v50 }
 0x305   : > { %v1499_v52 = vsel %vm1483_vm3, 0.0, %v1498_v51 }
 0x306   : > { %v1500_v53 = vsel %vm1486_vm4, inf, %v1499_v52 }
 0x307   : > { %1230 = vst [vmem:[%s2001_s16] sm:$0x1] %v1500_v53 }
 0x308 PF: > { %s1345_s27 = sshll.u32 %s1861_s28, 4  ;;  %s1244_s23 = sshll.u32 %s2001_s16, 4  ;;  %s1245_s23 = int_to_ptr.vmem [resolvable:$true] %s1244_s23 }
 0x309   : > { %s2216_s22 = scalar_lea.hbm %s2273_s7, %s1345_s27  ;;  %s1232_s9 = scalar_lea.sflag [#allocation4], %s292_s18 }
 0x30a   : > { %s1779_s10 = scalar_lea.vmem %s1245_s23, 16  ;;  %s1880_s19 = smov [#allocation3]  }
 0x30b   : > { %p1780_p2 = scmp.ne.s32.totalorder %s1245_s23, %s1779_s10  ;;  %s1783_s20 = sshll.u32 %s1880_s19, 4  ;;  %s1784_s20 = int_to_ptr.vmem [resolvable:$false] %s1783_s20 }
 0x30c   : > { %s1785_s0 = scalar_lea.vmem %s1784_s20, 32  ;;  %p1786_p6 = scmp.lt.s32.totalorder %s1245_s23, %s1784_s20 }
 0x30d   : > { %p1781_p4 = pnand %p1780_p2, %p1970_p3  ;;  %p1787_p7 = scmp.lt.s32.totalorder %s1785_s0, %s1779_s10 }
 0x30f   : > { %p1782_p5 = pneg %p1781_p4  ;;  %p1788_p8 = por %p1787_p7, %p1786_p6 }
 0x311   : > { %p1789_p10 = pnand %p1788_p8, %p1782_p5 }
 0x313   : > { %1792 = shalt.err (!%p1789_p10)
}
 0x314   : > { %s1793_s28 = scalar_lea.hbm %s2216_s22, 16  ;;  %s1797_s27 = scalar_lea.hbm %s2273_s7, 32 }
 0x315   : > { %p1794_p11 = scmp.ne.s32.totalorder %s2216_s22, %s1793_s28  ;;  %p1798_p0 = scmp.lt.u32.totalorder %s2216_s22, %s2273_s7 }
 0x316   : > { %p1799_p1 = scmp.lt.u32.totalorder %s1797_s27, %s1793_s28  ;;  %p1801_p4 = scmp.lt.u32.totalorder %s1793_s28, %s2216_s22 }
 0x317   : > { %p1795_p12 = pnand %p1794_p11, %p1970_p3 }
 0x318   : > { %p1800_p2 = por %p1799_p1, %p1798_p0 }
 0x319   : > { %p1796_p13 = pneg %p1795_p12 }
 0x31a   : > { %p1802_p5 = por %p1801_p4, %p1800_p2 }
 0x31c   : > { %p1803_p6 = pnand %p1802_p5, %p1796_p13 }
 0x31e   : > { %1806 = shalt.err (!%p1803_p6)
}
 0x31f   : > { %1501 = dma.vmem_to_hbm [thread:$0]  (%p1970_p3), %s1245_s23, 16, %s2216_s22, %s1232_s9  }
 0x320 PF: > { %p1507_p7 = scmp.ge.s32.totalorder %s1873_s8, 2  ;;  %s1256_s0 = sand.u32 1, %s1845_s24  }
 0x321   : > { %s1257_s10 = scalar_lea.sflag [#allocation4], %s1256_s0 }
 0x322   : > { %p1504_p8 = pnand %p1507_p7, %p1980_p9 }
 0x324   : > { %1840 = dma.done.wait (!%p1504_p8), %s1257_s10, 16  }
 0x325   : > { %1842 = vsyncadd (!%p1504_p8), %s1257_s10, 4294967280  ;;  %s20_s8 = sadd.s32 1, %s1873_s8   ;;  %s2278_s24 = smov %s1849_s25 }
 0x326   : > { %p17_p10 = scmp.ge.s32.totalorder %s20_s8, 10   ;;  %s2279_s25 = smov %s1853_s26 }
 0x327   : > { %s2280_s26 = smov %s1988_s17  ;;  %s2281_s27 = smov %s1865_s29 }
 0x328   : > { %s2282_s28 = smov %s1869_s30  ;;  %s2283_s29 = smov %s2286_s11 }
 0x329   : > { %s2284_s30 = smov %s2290_s12  ;;  %19 = sbr.rel (!%p17_p10) target bundleno = 7 (0x7), region = 91 }
 0x330   :  { %1261 = vsyncpa [#allocation4], 1 }
 0x331   :  { %1263 = vsyncpa [#allocation4 + $0x1], 1 }

</bundles_post_ra>
